<compile_context>
chip_gen: v7x
topology: tpu7x:2x2x1
jax: 0.10.0
libtpu: 0.0.40
codegen_flags: <defaults>
</compile_context>

<pallas_src>
import jax
import jax.numpy as jnp
from jax import lax
from jax.experimental import pallas as pl
from jax.experimental.pallas import tpu as pltpu


def _attn_kernel(q_ref, k_ref, w_ref, u_ref, v_ref, ctx_ref, attw_ref):
    # Per-grid-step views (TB batch elements at a time):
    #   q_ref   : (TB, D)      query_t block
    #   k_ref   : (TB, S, D)   keys block
    #   w_ref   : (D, D)       W_attn.weight
    #   u_ref   : (D, D)       U_attn.weight
    #   v_ref   : (1, D)       V_attn.weight
    #   ctx_ref : (TB, D)      context out (sublane-dense 2D block)
    #   attw_ref: (TB, S)      attention weights out (sublane-dense 2D block)
    TB, S, D = k_ref.shape

    q = q_ref[...]                                   # (TB, D)
    keys = k_ref[...]                                # (TB, S, D)

    # Query projection for the whole block: one (TB, D) x (D, D) MXU matmul.
    # (torch.nn.Linear applies x @ W^T, hence contraction on dim 1 of the weight.)
    q_proj = lax.dot_general(
        q, w_ref[...], (((1,), (1,)), ((), ())),
        preferred_element_type=jnp.float32)          # (TB, D)

    # Key projection as one real GEMM: collapse (TB, S, D) -> (TB*S, D).
    keys2d = keys.reshape(TB * S, D)
    k_proj = lax.dot_general(
        keys2d, u_ref[...], (((1,), (1,)), ((), ())),
        preferred_element_type=jnp.float32)          # (TB*S, D)
    k_proj = k_proj.reshape(TB, S, D)

    energy = jnp.tanh(q_proj[:, None, :] + k_proj)   # (TB, S, D)

    # Score: VPU multiply + lane reduce over D (avoids a 1-row MXU matmul).
    score = jnp.sum(energy * v_ref[...], axis=-1)    # (TB, S)

    # Softmax over the source-length axis.
    m = jnp.max(score, axis=-1, keepdims=True)
    e = jnp.exp(score - m)
    denom = jnp.sum(e, axis=-1, keepdims=True)
    # approx=False: the self-test compares against an exact f32 reference at 1e-5;
    # flip to approx=True (EUP vrcp) if that bit-level fidelity is not required.
    attw = e * pl.reciprocal(denom, approx=False)    # (TB, S)

    # Context: VPU multiply + sublane reduce over S (avoids a 1-row MXU matmul).
    ctx = jnp.sum(attw[:, :, None] * keys, axis=1)   # (TB, D)

    ctx_ref[...] = ctx.astype(ctx_ref.dtype)
    attw_ref[...] = attw.astype(attw_ref.dtype)


def _choose_tb(B, tb_max=256):
    """Pick a batch-block size: big (amortize grid overhead), multiple of 8 when
    there are several blocks (sublane-dense 2D stores), and >=2 blocks once B is
    large enough so both v7x TensorCores are used."""
    if B <= 8:
        return B                                    # single exact block
    n_blocks = max(2, -(-B // tb_max))
    tb = -(-B // n_blocks)
    return -(-tb // 8) * 8                          # round up to a multiple of 8


def attention_module_forward(query, keys, W_attn, U_attn, V_attn):
    """query: (B, L, H) with L >= 2; keys: (B, S, 2H). Returns (context, attn_weights)."""
    B, S, D = keys.shape
    # Bidirectional query construction (pure indexing glue, plain JAX): (B, D)
    query_t = jnp.concatenate([query[:, -2, :], query[:, -1, :]], axis=1)

    TB = _choose_tb(B)
    n_blocks = pl.cdiv(B, TB)
    B_pad = n_blocks * TB
    if B_pad != B:
        pad = B_pad - B
        # Zero padding is benign: scores are 0, softmax is uniform, context is 0;
        # the padded rows are sliced off below.
        query_t = jnp.pad(query_t, ((0, pad), (0, 0)))
        keys_in = jnp.pad(keys, ((0, pad), (0, 0), (0, 0)))
    else:
        keys_in = keys

    grid_spec = pltpu.PrefetchScalarGridSpec(
        num_scalar_prefetch=0,
        grid=(n_blocks,),
        in_specs=[
            pl.BlockSpec((TB, D), lambda b: (b, 0)),        # query_t block
            pl.BlockSpec((TB, S, D), lambda b: (b, 0, 0)),  # keys block
            pl.BlockSpec((D, D), lambda b: (0, 0)),         # W_attn
            pl.BlockSpec((D, D), lambda b: (0, 0)),         # U_attn
            pl.BlockSpec((1, D), lambda b: (0, 0)),         # V_attn
        ],
        out_specs=[
            pl.BlockSpec((TB, D), lambda b: (b, 0)),        # context (2D, dense)
            pl.BlockSpec((TB, S), lambda b: (b, 0)),        # attention weights (2D, dense)
        ],
    )

    ctx2d, attw2d = pl.pallas_call(
        _attn_kernel,
        grid_spec=grid_spec,
        out_shape=(
            jax.ShapeDtypeStruct((B_pad, D), jnp.float32),
            jax.ShapeDtypeStruct((B_pad, S), jnp.float32),
        ),
        compiler_params=pltpu.CompilerParams(
            dimension_semantics=("parallel",)),
    )(query_t, keys_in, W_attn, U_attn, V_attn)

    # Restore the module's (B, 1, D) / (B, 1, S) shapes; drop batch padding.
    context = ctx2d[:B][:, None, :]
    attn_weights = attw2d[:B][:, None, :]
    return context, attn_weights
    # TODO(synk): optional bf16 MXU inputs for v6e/v7x (cast keys/q_proj inputs to
    # bf16 with preferred_element_type=f32) once TB*S makes the U-GEMM non-trivial.


def _reference(query, keys, W_attn, U_attn, V_attn):
    query_t = jnp.concatenate([query[:, -2, :], query[:, -1, :]], axis=1)[:, None, :]
    q_proj = query_t @ W_attn.T
    k_proj = keys @ U_attn.T
    energy = jnp.tanh(q_proj + k_proj)
    score = (energy @ V_attn.T)[..., 0]                 # (B, S)
    attw = jax.nn.softmax(score, axis=1)[:, None, :]    # (B, 1, S)
    ctx = attw @ keys                                   # (B, 1, D)
    return ctx, attw


def _run_case(B, L, S, hidden_dim, seed):
    D = 2 * hidden_dim
    key = jax.random.PRNGKey(seed)
    k1, k2, k3, k4, k5 = jax.random.split(key, 5)

    W_attn = jax.random.normal(k1, (D, D), jnp.float32) * 0.1
    U_attn = jax.random.normal(k2, (D, D), jnp.float32) * 0.1
    V_attn = jax.random.normal(k3, (1, D), jnp.float32) * 0.1
    query = jax.random.normal(k4, (B, L, hidden_dim), jnp.float32)
    keys = jax.random.normal(k5, (B, S, D), jnp.float32)

    ctx, attw = attention_module_forward(query, keys, W_attn, U_attn, V_attn)
    ctx = jax.block_until_ready(ctx)
    attw = jax.block_until_ready(attw)

    ctx_ref, attw_ref = _reference(query, keys, W_attn, U_attn, V_attn)
    assert ctx.shape == (B, 1, D) and attw.shape == (B, 1, S)
    assert jnp.allclose(ctx, ctx_ref, atol=1e-5, rtol=1e-5)
    assert jnp.allclose(attw, attw_ref, atol=1e-5, rtol=1e-5)


if __name__ == "__main__":
    # Module config: layers=1, hidden_dim=16, bidirectional=True -> D = 32.
    # Small primary case (single block), plus a slightly larger one that exercises
    # the multi-block + batch-padding path.
    _run_case(B=2, L=4, S=8, hidden_dim=16, seed=0)
    _run_case(B=12, L=3, S=8, hidden_dim=16, seed=0)
    print("KERNEL_OK")
</pallas_src>

<mosaic_0001>
module attributes {stable_mosaic.version = 11 : i64} {
  func.func @_attn_kernel(%arg0: i32, %arg1: memref<2x32xf32, #tpu.memory_space<vmem>>, %arg2: memref<2x8x32xf32, #tpu.memory_space<vmem>>, %arg3: memref<32x32xf32, #tpu.memory_space<vmem>>, %arg4: memref<32x32xf32, #tpu.memory_space<vmem>>, %arg5: memref<1x32xf32, #tpu.memory_space<vmem>>, %arg6: memref<2x32xf32, #tpu.memory_space<vmem>>, %arg7: memref<2x8xf32, #tpu.memory_space<vmem>>) attributes {dimension_semantics = [#tpu.dimension_semantics<parallel>], iteration_bounds = array<i64: 1>, scalar_prefetch = 0 : i64, scratch_operands = 0 : i64, tpu.core_type = #tpu.core_type<tc>, window_params = [{transform_indices = @transform_0, window_bounds = array<i64: 2, 32>}, {transform_indices = @transform_1, window_bounds = array<i64: 2, 8, 32>}, {pipeline_mode = #tpu.pipeline_mode<synchronous>, transform_indices = @transform_2, window_bounds = array<i64: 32, 32>}, {pipeline_mode = #tpu.pipeline_mode<synchronous>, transform_indices = @transform_3, window_bounds = array<i64: 32, 32>}, {pipeline_mode = #tpu.pipeline_mode<synchronous>, transform_indices = @transform_4, window_bounds = array<i64: 1, 32>}, {transform_indices = @transform_5, window_bounds = array<i64: 2, 32>}, {transform_indices = @transform_6, window_bounds = array<i64: 2, 8>}]} {
    %c0 = arith.constant 0 : index
    %c0_0 = arith.constant 0 : index
    %0 = vector.load %arg1[%c0, %c0_0] : memref<2x32xf32, #tpu.memory_space<vmem>>, vector<2x32xf32>
    %c0_1 = arith.constant 0 : index
    %c0_2 = arith.constant 0 : index
    %c0_3 = arith.constant 0 : index
    %1 = vector.load %arg2[%c0_1, %c0_2, %c0_3] : memref<2x8x32xf32, #tpu.memory_space<vmem>>, vector<2x8x32xf32>
    %c0_4 = arith.constant 0 : index
    %c0_5 = arith.constant 0 : index
    %2 = vector.load %arg3[%c0_4, %c0_5] : memref<32x32xf32, #tpu.memory_space<vmem>>, vector<32x32xf32>
    %cst = arith.constant dense<0.000000e+00> : vector<2x32xf32>
    %3 = tpu.matmul %0, %2, %cst {dimension_numbers = #tpu.dot_dimension_numbers<[1], [1], [0], [0], [0, 0, 1, 0], [], []>} : vector<2x32xf32>, vector<32x32xf32>, vector<2x32xf32> -> vector<2x32xf32>
    %4 = vector.shape_cast %1 : vector<2x8x32xf32> to vector<16x32xf32>
    %c0_6 = arith.constant 0 : index
    %c0_7 = arith.constant 0 : index
    %5 = vector.load %arg4[%c0_6, %c0_7] : memref<32x32xf32, #tpu.memory_space<vmem>>, vector<32x32xf32>
    %cst_8 = arith.constant dense<0.000000e+00> : vector<16x32xf32>
    %6 = tpu.matmul %4, %5, %cst_8 {dimension_numbers = #tpu.dot_dimension_numbers<[1], [1], [0], [0], [0, 0, 1, 0], [], []>} : vector<16x32xf32>, vector<32x32xf32>, vector<16x32xf32> -> vector<16x32xf32>
    %7 = vector.shape_cast %6 : vector<16x32xf32> to vector<2x8x32xf32>
    %8 = vector.shape_cast %3 : vector<2x32xf32> to vector<2x1x32xf32>
    %9 = vector.broadcast %8 : vector<2x1x32xf32> to vector<2x8x32xf32>
    %10 = arith.addf %9, %7 : vector<2x8x32xf32>
    %11 = math.tanh %10 : vector<2x8x32xf32>
    %c0_9 = arith.constant 0 : index
    %c0_10 = arith.constant 0 : index
    %12 = vector.load %arg5[%c0_9, %c0_10] : memref<1x32xf32, #tpu.memory_space<vmem>>, vector<1x32xf32>
    %13 = vector.shape_cast %12 : vector<1x32xf32> to vector<1x1x32xf32>
    %14 = vector.broadcast %13 : vector<1x1x32xf32> to vector<2x8x32xf32>
    %15 = arith.mulf %11, %14 : vector<2x8x32xf32>
    %cst_11 = arith.constant dense<0.000000e+00> : vector<2x8xf32>
    %16 = vector.multi_reduction <add>, %15, %cst_11 [2] : vector<2x8x32xf32> to vector<2x8xf32>
    %cst_12 = arith.constant dense<0xFF800000> : vector<2xf32>
    %17 = vector.multi_reduction <maximumf>, %16, %cst_12 [1] : vector<2x8xf32> to vector<2xf32>
    %18 = vector.shape_cast %17 : vector<2xf32> to vector<2x1xf32>
    %19 = vector.broadcast %18 : vector<2x1xf32> to vector<2x8xf32>
    %20 = arith.subf %16, %19 : vector<2x8xf32>
    %21 = math.exp %20 : vector<2x8xf32>
    %cst_13 = arith.constant dense<0.000000e+00> : vector<2xf32>
    %22 = vector.multi_reduction <add>, %21, %cst_13 [1] : vector<2x8xf32> to vector<2xf32>
    %23 = vector.shape_cast %22 : vector<2xf32> to vector<2x1xf32>
    %24 = tpu.reciprocal %23 : vector<2x1xf32> -> vector<2x1xf32>
    %25 = vector.broadcast %24 : vector<2x1xf32> to vector<2x8xf32>
    %26 = arith.mulf %21, %25 : vector<2x8xf32>
    %27 = vector.shape_cast %26 : vector<2x8xf32> to vector<2x8x1xf32>
    %28 = vector.broadcast %27 : vector<2x8x1xf32> to vector<2x8x32xf32>
    %29 = arith.mulf %28, %1 : vector<2x8x32xf32>
    %cst_14 = arith.constant dense<0.000000e+00> : vector<2x32xf32>
    %30 = vector.multi_reduction <add>, %29, %cst_14 [1] : vector<2x8x32xf32> to vector<2x32xf32>
    %c0_15 = arith.constant 0 : index
    %c0_16 = arith.constant 0 : index
    %31 = vector.load %arg6[%c0_15, %c0_16] : memref<2x32xf32, #tpu.memory_space<vmem>>, vector<2x32xf32>
    tpu.vector_store %arg6[%c0_15, %c0_16], %30 {strides = array<i32>} : memref<2x32xf32, #tpu.memory_space<vmem>>, vector<2x32xf32>,
    %c0_17 = arith.constant 0 : index
    %c0_18 = arith.constant 0 : index
    %32 = vector.load %arg7[%c0_17, %c0_18] : memref<2x8xf32, #tpu.memory_space<vmem>>, vector<2x8xf32>
    tpu.vector_store %arg7[%c0_17, %c0_18], %26 {strides = array<i32>} : memref<2x8xf32, #tpu.memory_space<vmem>>, vector<2x8xf32>,
    return
  }
  func.func @transform_0(%arg0: i32) -> (i32, i32) {
    %c0_i32 = arith.constant 0 : i32
    %c0_i32_0 = arith.constant 0 : i32
    return %arg0, %c0_i32 : i32, i32
  }
  func.func @transform_1(%arg0: i32) -> (i32, i32, i32) {
    %c0_i32 = arith.constant 0 : i32
    %c0_i32_0 = arith.constant 0 : i32
    %c0_i32_1 = arith.constant 0 : i32
    return %arg0, %c0_i32, %c0_i32_0 : i32, i32, i32
  }
  func.func @transform_2(%arg0: i32) -> (i32, i32) {
    %c0_i32 = arith.constant 0 : i32
    %c0_i32_0 = arith.constant 0 : i32
    %c0_i32_1 = arith.constant 0 : i32
    return %c0_i32, %c0_i32_0 : i32, i32
  }
  func.func @transform_3(%arg0: i32) -> (i32, i32) {
    %c0_i32 = arith.constant 0 : i32
    %c0_i32_0 = arith.constant 0 : i32
    %c0_i32_1 = arith.constant 0 : i32
    return %c0_i32, %c0_i32_0 : i32, i32
  }
  func.func @transform_4(%arg0: i32) -> (i32, i32) {
    %c0_i32 = arith.constant 0 : i32
    %c0_i32_0 = arith.constant 0 : i32
    %c0_i32_1 = arith.constant 0 : i32
    return %c0_i32, %c0_i32_0 : i32, i32
  }
  func.func @transform_5(%arg0: i32) -> (i32, i32) {
    %c0_i32 = arith.constant 0 : i32
    %c0_i32_0 = arith.constant 0 : i32
    return %arg0, %c0_i32 : i32, i32
  }
  func.func @transform_6(%arg0: i32) -> (i32, i32) {
    %c0_i32 = arith.constant 0 : i32
    %c0_i32_0 = arith.constant 0 : i32
    return %arg0, %c0_i32 : i32, i32
  }
}

</mosaic_0001>

<bundles_post_ra>
// kernel: tpu_custom_call.1
= control target key start
LH: loop header
LB: loop body
LE: loop exit
PB: predicated region body
PF: predicated region fallthrough
CT: control target
= control target key end

     0   :  { %12 = vsyncpa [#allocation3], 0  ;;  %s874_s0 = inlined_call_operand.hbm [shape: f32[2,32], index: 0, kind: input, shape index: {}]   ;;  %s875_s1 = inlined_call_operand.hbm [shape: f32[2,8,32], index: 1, kind: input, shape index: {}]   ;;  %s876_s2 = inlined_call_operand.hbm [shape: f32[32,32], index: 2, kind: input, shape index: {}]   ;;  %s877_s3 = inlined_call_operand.hbm [shape: f32[32,32], index: 3, kind: input, shape index: {}]   ;;  %s878_s4 = inlined_call_operand.vmem [shape: f32[1,32], index: 4, kind: input, shape index: {}]   ;;  %s879_s5 = inlined_call_operand.hbm [shape: f32[2,32], index: 5, kind: output, shape index: {0}]   ;;  %s880_s6 = inlined_call_operand.hbm [shape: f32[2,8], index: 6, kind: output, shape index: {1}]  }
   0x1   :  { %13 = vsyncpa [#allocation6], 0 }
   0x2   :  { %14 = vsyncpa [#allocation9], 0 }
   0x3   :  { %15 = vsyncpa [#allocation4], 0 }
   0x4   :  { %16 = vsyncpa [#allocation12], 0  ;;  %s696_s21 = smov [#allocation5]   ;;  %s554_s25 = scalar_lea.hbm %s875_s1, 256 }
   0x5   :  { %s32_s22 = sshll.u32 %s696_s21, 4  ;;  %p555_p0 = scmp.ne.s32.totalorder %s875_s1, %s554_s25  ;;  %s33_s22 = int_to_ptr.vmem [resolvable:$true] %s32_s22 }
   0x6   :  { %p558_p1 = scmp.lt.u32.totalorder %s554_s25, %s875_s1 }
   0x8   :  { %p560_p2 = pnand %p558_p1, %p555_p0 }
   0xa   :  { %563 = shalt.err (!%p560_p2)
}
   0xb   :  { %s564_s30 = scalar_lea.vmem %s33_s22, 256  ;;  %p569_p4 = scmp.lt.s32.totalorder %s33_s22, %s33_s22 }
   0xc   :  { %p565_p3 = scmp.ne.s32.totalorder %s33_s22, %s564_s30  ;;  %p570_p5 = scmp.lt.s32.totalorder %s564_s30, %s564_s30 }
   0xe   :  { %p571_p6 = por %p570_p5, %p569_p4 }
  0x10   :  { %p572_p7 = pnand %p571_p6, %p565_p3 }
  0x12   :  { %575 = shalt.err (!%p572_p7)
}
  0x13   :  { %s697_s7 = smov 128   ;;  %s698_s8 = smov 8  }
  0x14   :  { %38 = dma.hbm_to_vmem [thread:$0]  %s875_s1, 256, %s33_s22, [#allocation6], %s697_s7, %s697_s7, %s698_s8  }
  0x15   :  { %s699_s11 = smov [#allocation2]   ;;  %s700_s13 = smov [#allocation7]  }
  0x16   :  { %s23_s12 = sshll.u32 %s699_s11, 4  ;;  %s44_s14 = sshll.u32 %s700_s13, 4  ;;  %s24_s12 = int_to_ptr.vmem [resolvable:$true] %s23_s12  ;;  %s45_s14 = int_to_ptr.vmem [resolvable:$true] %s44_s14 }
  0x17   :  { %s576_s17 = scalar_lea.hbm %s874_s0, 32 }
  0x18   :  { %p577_p8 = scmp.ne.s32.totalorder %s874_s0, %s576_s17  ;;  %p580_p9 = scmp.lt.u32.totalorder %s576_s17, %s874_s0 }
  0x1a   :  { %p582_p10 = pnand %p580_p9, %p577_p8 }
  0x1c   :  { %585 = shalt.err (!%p582_p10)
}
  0x1d   :  { %s586_s1 = scalar_lea.vmem %s24_s12, 32  ;;  %p591_p12 = scmp.lt.s32.totalorder %s24_s12, %s24_s12 }
  0x1e   :  { %p587_p11 = scmp.ne.s32.totalorder %s24_s12, %s586_s1  ;;  %p592_p13 = scmp.lt.s32.totalorder %s586_s1, %s586_s1 }
  0x20   :  { %p593_p0 = por %p592_p13, %p591_p12 }
  0x22   :  { %p594_p1 = pnand %p593_p0, %p587_p11 }
  0x24   :  { %597 = shalt.err (!%p594_p1)
}
  0x25   :  { %26 = dma.hbm_to_vmem [thread:$0]  %s874_s0, 32, %s24_s12, [#allocation3]  }
  0x26   :  { %s598_s26 = scalar_lea.hbm %s876_s2, 512 }
  0x27   :  { %p599_p2 = scmp.ne.s32.totalorder %s876_s2, %s598_s26  ;;  %p602_p3 = scmp.lt.u32.totalorder %s598_s26, %s876_s2 }
  0x29   :  { %p604_p4 = pnand %p602_p3, %p599_p2 }
  0x2b   :  { %607 = shalt.err (!%p604_p4)
}
  0x2c   :  { %s608_s9 = scalar_lea.vmem %s45_s14, 512  ;;  %p613_p6 = scmp.lt.s32.totalorder %s45_s14, %s45_s14 }
  0x2d   :  { %p609_p5 = scmp.ne.s32.totalorder %s45_s14, %s608_s9  ;;  %p614_p7 = scmp.lt.s32.totalorder %s608_s9, %s608_s9 }
  0x2f   :  { %p615_p8 = por %p614_p7, %p613_p6 }
  0x31   :  { %p616_p9 = pnand %p615_p8, %p609_p5 }
  0x33   :  { %619 = shalt.err (!%p616_p9)
}
  0x34   :  { %50 = dma.hbm_to_vmem [thread:$0]  %s876_s2, 512, %s45_s14, [#allocation6], %s697_s7, %s697_s7, %s698_s8  }
  0x35   :  { %s701_s11 = smov [#allocation8]   ;;  %s620_s16 = scalar_lea.hbm %s877_s3, 512 }
  0x36   :  { %s56_s12 = sshll.u32 %s701_s11, 4  ;;  %p621_p10 = scmp.ne.s32.totalorder %s877_s3, %s620_s16  ;;  %s57_s12 = int_to_ptr.vmem [resolvable:$true] %s56_s12 }
  0x37   :  { %p624_p11 = scmp.lt.u32.totalorder %s620_s16, %s877_s3 }
  0x39   :  { %p626_p12 = pnand %p624_p11, %p621_p10 }
  0x3b   :  { %629 = shalt.err (!%p626_p12)
}
  0x3c   :  { %s630_s21 = scalar_lea.vmem %s57_s12, 512  ;;  %p635_p0 = scmp.lt.s32.totalorder %s57_s12, %s57_s12 }
  0x3d   :  { %p631_p13 = scmp.ne.s32.totalorder %s57_s12, %s630_s21  ;;  %p636_p1 = scmp.lt.s32.totalorder %s630_s21, %s630_s21 }
  0x3f   :  { %p637_p2 = por %p636_p1, %p635_p0 }
  0x41   :  { %p638_p3 = pnand %p637_p2, %p631_p13 }
  0x43   :  { %641 = shalt.err (!%p638_p3)
}
  0x44   :  { %62 = dma.hbm_to_vmem [thread:$0]  %s877_s3, 512, %s57_s12, [#allocation9], %s697_s7, %s697_s7, %s698_s8  }
  0x45   :  { %686 = dma.done.wait [#allocation3], 32  }
  0x46   :  { %687 = vsyncadd [#allocation3], 4294967264 }
  0x47   :  { %688 = dma.done.wait [#allocation6], 768  }
  0x48   :  { %689 = vsyncadd [#allocation6], 4294966528 }
  0x49   :  { %690 = dma.done.wait [#allocation9], 512  }
  0x4a   :  { %691 = vsyncadd [#allocation9], 4294966784  ;;  %v702_v0 = vmov 0.0|0.0   ;;  %vm703_vm0 = vmmov 0   ;;  %v704_v1 = vmov 0.0   ;;  %vm84_vm1 = vcmask 261120  }
  0x4b   :  { %509 = vmatprep.subr.bf16.mxu0 %v702_v0  ;;  %495 = vmatprep.mubr.msk.f32.mxu0 %vm703_vm0, %v704_v1  ;;  %vm803_vm2 = vmpackc.low %vm84_vm1, %vm84_vm1  ;;  %v80_v3 = vld [vmem:[#allocation7] sm:$0xff]  ;;  %v81_v4 = vld [vmem:[#allocation7 + $0x8] sm:$0xff]  ;;  %v705_v18 = vmov 1966171168   ;;  %v271_v20 = vlaneseq  ;;  %vm331_vm3 = vcmask 1041409   ;;  %vm334_vm4 = vcmask 58368  }
  0x4c   :  { %v170_v5 = vld [vmem:[#allocation8] sm:$0xff]  ;;  %v510_v6 = vpack.c.bf16 %v81_v4, %v80_v3  ;;  %v171_v7 = vld [vmem:[#allocation8 + $0x8] sm:$0xff]  ;;  %v172_v9 = vld [vmem:[#allocation8 + $0x10] sm:$0xff]  ;;  %v269_v19 = vunpack.c.l.s4 %v705_v18  ;;  %v706_v52 = vmov 0  }
  0x4d   :  { %v517_v8 = vpack.c.bf16 %v171_v7, %v170_v5  ;;  %v173_v10 = vld [vmem:[#allocation8 + $0x18] sm:$0xff]  ;;  %v809_v12 = vld [vmem:[#allocation5] sm:$0xff]  ;;  %v77_v16 = vld [vmem:[#allocation2] sm:$0x3]  ;;  %v828_v22 = vshrl.u32 %v271_v20, 7  ;;  %v322_v44 = vand.u32 127, %v271_v20  ;;  %543 = vset.pattern.permute.xlu0 %v706_v52  ;;  %542 = vset.pattern.permute.xlu1 %v706_v52 }
  0x4e   :  { %512 = vmatpush3.bf16.xpose.msk.msra.mxu0 %vm803_vm2, %v510_v6  ;;  %v523_v11 = vpack.c.bf16 %v173_v10, %v172_v9  ;;  %v82_v13 = vld [vmem:[#allocation7 + $0x10] sm:$0xff]  ;;  %v83_v14 = vld [vmem:[#allocation7 + $0x18] sm:$0xff]  ;;  %506 = vmatprep.mubr.msk.f32.mxu1 %vm84_vm1, %v809_v12  ;;  %v270_v21 = vunpack.c.0.s8 %v269_v19  ;;  %v475_v37 = vld [vmem:[%s878_s4] ss:$0 sm:$0xff]  ;;  %s707_s4 = smov [#allocation11]  }
  0x4f   :  { %519 = vmatprep.subr.msk.bf16.mxu1 %vm803_vm2, %v517_v8  ;;  %513 = vmatprep.subr.bf16.mxu0 %v702_v0  ;;  %v514_v15 = vpack.c.bf16 %v83_v14, %v82_v13  ;;  %v823_v17 = vld [vmem:[#allocation5 + $0x8] sm:$0xff]  ;;  %v292_v27 = vsub.s32 0, %v828_v22  ;;  %v325_v46 = vsub.s32 %v322_v44, %v828_v22  ;;  %v345_v53 = vsub.s32 1, %v828_v22  ;;  %s449_s8 = sshll.u32 %s707_s4, 4  ;;  %s450_s8 = int_to_ptr.vmem [resolvable:$true] %s449_s8 }
  0x50   :  { %522 = vmatpush3.bf16.xpose.msk.msra.mxu1 %vm803_vm2, %v517_v8  ;;  %v273_v23 = vsub.s32 %v270_v21, %v828_v22  ;;  %s642_s1 = scalar_lea.vmem %s450_s8, 32  ;;  %p647_p5 = scmp.lt.s32.totalorder %s450_s8, %s450_s8 }
  0x51   :  { %525 = vmatprep.subr.msk.bf16.mxu1 %vm803_vm2, %v523_v11  ;;  %p643_p4 = scmp.ne.s32.totalorder %s450_s8, %s642_s1  ;;  %p648_p6 = scmp.lt.s32.totalorder %s642_s1, %s642_s1 }
  0x53   :  { %p649_p7 = por %p648_p6, %p647_p5 }
  0x55   :  { %p650_p8 = pnand %p649_p7, %p643_p4 }
  0x56   :  { %516 = vmatpush3.bf16.xpose.msk.msra.mxu0 %vm803_vm2, %v514_v15 }
  0x58   :  { %528 = vmatpush3.bf16.xpose.msk.msra.mxu1 %vm803_vm2, %v523_v11 }
  0x5d   :  { %496 = vmatmul.mubr.msk.f32.vlgmr.msra.gmra.mrb[0].mxu0 %vm84_vm1, %v77_v16 }
  0x5f   :  { %507 = vmatmul.mubr.msk.f32.vlgmr.msra.gmra.mrb[0].mxu1 %vm84_vm1, %v823_v17 }
 0x130   :  { %v166_v24 = vpop.f32.mrb[0].mxu0 }
 0x131   :  { %v274_v25 = vrot.slane %v166_v24, %v273_v23  ;;  %v497_v26 = vpop.f32.mrb[1].mxu0 }
 0x132   :  { %v508_v28 = vpop.f32.mrb[0].mxu1 }
 0x133   :  { %v275_v29 = vcombine.high %v274_v25, %v274_v25  ;;  %v282_v30 = vrot.slane %v274_v25, %v273_v23  ;;  %v258_v31 = vpop.f32.mrb[1].mxu1 }
 0x135   :  { %v289_v32 = vrot.slane %v275_v29, %v273_v23  ;;  %v293_v33 = vrot.slane %v282_v30, %v292_v27 }
 0x137   :  { %v297_v34 = vrot.slane %v289_v32, %v292_v27  ;;  %v300_v35 = vadd.f32 %v293_v33, %v258_v31 }
 0x139   :  { %v301_v36 = vadd.f32 %v508_v28, %v297_v34  ;;  %544 = vtanh.f32 %v300_v35 }
 0x13b   :  { %546 = vtanh.f32 %v301_v36 }
 0x143   :  { %v545_v38 = vpop.eup %544 }
 0x144   :  { %v311_v39 = vmul.f32 %v545_v38, %v475_v37 }
 0x145   :  { %v547_v40 = vpop.eup %546 }
 0x146   :  { %v313_v41 = vsel %vm84_vm1, %v311_v39, 0.0  ;;  %v312_v42 = vmul.f32 %v547_v40, %v475_v37 }
 0x147   :  { %314 = vadd.xlane.f32.xlu0 %v313_v41 }
 0x148   :  { %v316_v43 = vsel %vm84_vm1, %v312_v42, 0.0 }
 0x14b   :  { %317 = vadd.xlane.f32.xlu0 %v316_v43 }
 0x1d4   :  { %v315_v45 = vpop.xlane.xlu0 %314 }
 0x1d5   :  { %v326_v48 = vrot.slane %v315_v45, %v325_v46 }
 0x1d8   :  { %v318_v47 = vpop.xlane.xlu0 %317 }
 0x1d9   :  { %v330_v49 = vrot.slane %v318_v47, %v325_v46 }
 0x1db   :  { %v332_v50 = vsel %vm331_vm3, %v330_v49, %v326_v48 }
 0x1dc   :  { %v335_v51 = vsel %vm334_vm4, %v332_v50, -inf }
 0x1dd   :  { %336 = vmax.xlane.f32.xlu1 %v335_v51 }
 0x26a   :  { %v337_v54 = vpop.xlane.xlu1 %336 }
 0x26b   :  { %v342_v55 = vrot.slane %v337_v54, %v292_v27  ;;  %v346_v56 = vrot.slane %v337_v54, %v345_v53 }
 0x26d   :  { %v349_v57 = vsub.f32 %v315_v45, %v342_v55  ;;  %v350_v58 = vsub.f32 %v318_v47, %v346_v56 }
 0x26f   :  { %v351_v59 = vmul.f32 1.442695, %v349_v57  ;;  %v353_v60 = vmul.f32 1.442695, %v350_v58 }
 0x271   :  { %548 = vpow2.f32 %v351_v59 }
 0x272   :  { %550 = vpow2.f32 %v353_v60 }
 0x27b   :  { %v549_v61 = vpop.eup %548 }
 0x27c   :  { %v551_v62 = vpop.eup %550  ;;  %358 = vperm.xlu1 %542, %v549_v61  }
 0x27d   :  { %361 = vperm.xlu0 %543, %v551_v62  }
 0x2fb   :  { %v359_v63 = vpop.permute.xlu1 %358 }
 0x2fc   :  { %v362_v0 = vpop.permute.xlu0 %361  ;;  %v366_v1 = vrot.slane %v359_v63, %v325_v46 }
 0x2fd   :  { %v370_v2 = vrot.slane %v362_v0, %v325_v46 }
 0x2ff   :  { %v371_v3 = vsel %vm331_vm3, %v370_v2, %v366_v1 }
 0x300   :  { %v373_v4 = vsel %vm334_vm4, %v371_v3, 0.0 }
 0x301   :  { %374 = vadd.xlane.f32.xlu1 %v373_v4 }
 0x38e   :  { %v375_v5 = vpop.xlane.xlu1 %374 }
 0x38f   :  { %552 = vrcp.f32 %v375_v5 }
 0x399   :  { %v553_v6 = vpop.eup %552 }
 0x39a   :  { %v381_v7 = vrot.slane %v553_v6, %v292_v27  ;;  %v385_v9 = vrot.slane %v553_v6, %v345_v53 }
 0x39c   :  { %v388_v8 = vmul.f32 %v549_v61, %v381_v7  ;;  %v389_v10 = vmul.f32 %v551_v62, %v385_v9 }
 0x39e   :  { %392 = vperm.xlu0 %543, %v388_v8  }
 0x3a2   :  { %397 = vperm.xlu0 %543, %v389_v10  }
 0x41d   :  { %v393_v11 = vpop.permute.xlu0 %392 }
 0x41e   :  { %v400_v13 = vmul.f32 %v393_v11, %v809_v12  ;;  %v425_v18 = vrot.slane %v393_v11, %v325_v46 }
 0x420   :  { %v402_v14 = vsel %vm84_vm1, %v400_v13, 0.0 }
 0x421   :  { %v403_v15 = vrot.slane %v402_v14, 4  ;;  %v398_v16 = vpop.permute.xlu0 %397 }
 0x422   :  { %v401_v19 = vmul.f32 %v398_v16, %v823_v17  ;;  %v429_v20 = vrot.slane %v398_v16, %v325_v46 }
 0x423   :  { %v404_v21 = vadd.f32 %v403_v15, %v402_v14 }
 0x424   :  { %v409_v22 = vsel %vm84_vm1, %v401_v19, 0.0  ;;  %v430_v23 = vsel %vm331_vm3, %v429_v20, %v425_v18 }
 0x425   :  { %v405_v24 = vrot.slane %v404_v21, 2  ;;  %v410_v25 = vrot.slane %v409_v22, 4  ;;  %432 = vst.msk [vmem:[#allocation11] sm:$0x3] %vm334_vm4, %v430_v23 }
 0x426   :  { %653 = shalt.err (!%p650_p8)
}
 0x427   :  { %s654_s24 = scalar_lea.hbm %s880_s6, 32 }
 0x428   :  { %p655_p9 = scmp.ne.s32.totalorder %s880_s6, %s654_s24  ;;  %p658_p10 = scmp.lt.u32.totalorder %s654_s24, %s880_s6 }
 0x42a   :  { %p660_p11 = pnand %p658_p10, %p655_p9 }
 0x42c   :  { %663 = shalt.err (!%p660_p11)
}
 0x42d   :  { %452 = dma.vmem_to_hbm [thread:$0]  %s450_s8, 32, %s880_s6, [#allocation12]   ;;  %v406_v12 = vadd.f32 %v405_v24, %v404_v21  ;;  %v411_v17 = vadd.f32 %v410_v25, %v409_v22  ;;  %vm420_vm5 = vcmask 254976  }
 0x42e   :  { %s708_s9 = smov [#allocation10]  }
 0x42f   :  { %v412_v26 = vrot.slane %v411_v17, 2  ;;  %v407_v27 = vrot.slane %v406_v12, 1  ;;  %s439_s0 = sshll.u32 %s708_s9, 4  ;;  %s440_s0 = int_to_ptr.vmem [resolvable:$true] %s439_s0 }
 0x430   :  { %s664_s10 = scalar_lea.vmem %s440_s0, 32  ;;  %p669_p13 = scmp.lt.s32.totalorder %s440_s0, %s440_s0 }
 0x431   :  { %v413_v28 = vadd.f32 %v412_v26, %v411_v17  ;;  %v408_v31 = vadd.f32 %v407_v27, %v406_v12  ;;  %p665_p12 = scmp.ne.s32.totalorder %s440_s0, %s664_s10  ;;  %p670_p0 = scmp.lt.s32.totalorder %s664_s10, %s664_s10 }
 0x433   :  { %v414_v29 = vrot.slane %v413_v28, 1  ;;  %p671_p1 = por %p670_p0, %p669_p13 }
 0x435   :  { %v415_v30 = vadd.f32 %v414_v29, %v413_v28  ;;  %p672_p2 = pnand %p671_p1, %p665_p12 }
 0x437   :  { %v418_v32 = vsel %vm331_vm3, %v415_v30, %v408_v31 }
 0x438   :  { %421 = vst.msk [vmem:[#allocation10] sm:$0x3] %vm420_vm5, %v418_v32 }
 0x439   :  { %675 = shalt.err (!%p672_p2)
}
 0x43a   :  { %s676_s12 = scalar_lea.hbm %s879_s5, 32 }
 0x43b   :  { %p677_p3 = scmp.ne.s32.totalorder %s879_s5, %s676_s12  ;;  %p680_p4 = scmp.lt.u32.totalorder %s676_s12, %s879_s5 }
 0x43d   :  { %p682_p5 = pnand %p680_p4, %p677_p3 }
 0x43f   :  { %685 = shalt.err (!%p682_p5)
}
 0x440   :  { %442 = dma.vmem_to_hbm [thread:$0]  %s440_s0, 32, %s879_s5, [#allocation4]  }
 0x441   :  { %692 = dma.done.wait [#allocation4], 32  }
 0x442   :  { %693 = vsyncadd [#allocation4], 4294967264 }
 0x443   :  { %694 = dma.done.wait [#allocation12], 32  }
 0x444   :  { %695 = vsyncadd [#allocation12], 4294967264 }
 0x445   :  { %459 = vsyncpa [#allocation3], 1 }
 0x446   :  { %460 = vsyncpa [#allocation6], 1 }
 0x447   :  { %461 = vsyncpa [#allocation9], 1 }
 0x448   :  { %462 = vsyncpa [#allocation4], 1 }
 0x449   :  { %463 = vsyncpa [#allocation12], 1 }

</bundles_post_ra>
